<compile_context>
chip_gen: v7x
topology: tpu7x:2x2x1
jax: 0.10.0
libtpu: 0.0.40
codegen_flags: <defaults>
</compile_context>

<pallas_src>
import functools

import jax
import jax.numpy as jnp
from jax.experimental import pallas as pl
from jax.experimental.pallas import tpu as pltpu


def _round_up(x, m):
    return ((x + m - 1) // m) * m


_VMEM_LIMIT = 64 * 1024 * 1024  # explicit scoped-VMEM cap (v5e default is 16 MiB)


# ----------------------------------------------------------------------------
# Standalone pdist kernel (the module's sampler.dist_func), column tiled.
# ----------------------------------------------------------------------------
def _pdist_kernel(eps, squared, t, e_rows_ref, e_cols_ref, row_sq_ref,
                  col_sq_ref, o_ref):
    i = pl.program_id(0)
    j = pl.program_id(1)

    prod = jax.lax.dot_general(
        e_rows_ref[...], e_cols_ref[...], (((1,), (1,)), ((), ())),
        preferred_element_type=jnp.float32)                     # (T, T)
    res = row_sq_ref[...] + col_sq_ref[...] - 2.0 * prod
    res = jnp.maximum(res, eps)
    if not squared:
        res = jnp.sqrt(res)

    # Only tiles on the diagonal pay the iota/compare/select epilogue.
    @pl.when(i != j)
    def _off_diag():
        o_ref[...] = res

    @pl.when(i == j)
    def _on_diag():
        row = jax.lax.broadcasted_iota(jnp.int32, res.shape, 0) + i * t
        col = jax.lax.broadcasted_iota(jnp.int32, res.shape, 1) + j * t
        o_ref[...] = jnp.where(row == col, 0.0, res)


def pdist_pallas(e, squared=False, eps=1e-12, t=256):
    """Pallas version of `pdist` from the spec. e: (N, D) -> (N, N) float32."""
    n, d = e.shape
    t = min(t, _round_up(n, 128))
    n_pad = _round_up(n, t)

    e32 = e.astype(jnp.float32)
    if n_pad != n:
        e32 = jnp.pad(e32, ((0, n_pad - n), (0, 0)))
    sq = jnp.sum(e32 * e32, axis=1)
    row_sq = sq.reshape(n_pad, 1)
    col_sq = sq.reshape(1, n_pad)

    kernel = functools.partial(_pdist_kernel, eps, squared, t)
    out = pl.pallas_call(
        kernel,
        out_shape=jax.ShapeDtypeStruct((n_pad, n_pad), jnp.float32),
        grid_spec=pltpu.PrefetchScalarGridSpec(
            num_scalar_prefetch=0,
            grid=(n_pad // t, n_pad // t),
            in_specs=[
                pl.BlockSpec((t, d), lambda i, j: (i, 0)),   # row tile
                pl.BlockSpec((t, d), lambda i, j: (j, 0)),   # column tile
                pl.BlockSpec((t, 1), lambda i, j: (i, 0)),   # |e_row|^2
                pl.BlockSpec((1, t), lambda i, j: (0, j)),   # |e_col|^2
            ],
            out_specs=pl.BlockSpec((t, t), lambda i, j: (i, j)),
        ),
        compiler_params=pltpu.CompilerParams(
            dimension_semantics=("parallel", "parallel"),
            vmem_limit_bytes=_VMEM_LIMIT),
    )(e32, e32, row_sq, col_sq)
    return out[:n, :n]


# ----------------------------------------------------------------------------
# Fused pdist + hardest-positive / hardest-negative mining.
# The N x N distance matrix never leaves VMEM; only the indices go to HBM.
# ----------------------------------------------------------------------------
def _pdist_mine_kernel(n_total, t, e_rows_ref, e_cols_ref, row_sq_ref,
                       col_sq_ref, row_lab_ref, col_lab_ref,
                       pos_idx_ref, neg_idx_ref, pos_val_sc, neg_val_sc):
    i = pl.program_id(0)   # row tile (parallel)
    j = pl.program_id(1)   # column tile (carried / arbitrary)

    @pl.when(j == 0)
    def _init():
        pos_val_sc[...] = jnp.full(pos_val_sc.shape, -jnp.inf, jnp.float32)
        neg_val_sc[...] = jnp.full(neg_val_sc.shape, jnp.inf, jnp.float32)
        self_idx = jax.lax.broadcasted_iota(jnp.int32, pos_idx_ref.shape, 0) + i * t
        pos_idx_ref[...] = self_idx     # fallback if a row has no valid pos/neg
        neg_idx_ref[...] = self_idx

    er = e_rows_ref[...]                                   # (T, D)
    ec = e_cols_ref[...]                                   # (T, D)
    prod = jax.lax.dot_general(er, ec, (((1,), (1,)), ((), ())),
                               preferred_element_type=jnp.float32)   # (T, T)
    dist = row_sq_ref[...] + col_sq_ref[...] - 2.0 * prod
    dist = jnp.maximum(dist, 1e-12)          # pdist clamp (squared, p == 2)

    row_g = jax.lax.broadcasted_iota(jnp.float32, dist.shape, 0) + (i * t).astype(jnp.float32)
    col_g = jax.lax.broadcasted_iota(jnp.float32, dist.shape, 1) + (j * t).astype(jnp.float32)
    same = row_lab_ref[...] == col_lab_ref[...]            # (T,1)==(1,T) -> (T,T)
    col_valid = col_g < jnp.float32(n_total)               # mask padded columns
    pos_mask = same & (row_g != col_g) & col_valid
    neg_mask = jnp.logical_not(same) & col_valid

    big_f = jnp.float32(2 ** 30)

    # hardest positive (max squared distance with same label, excluding self)
    pm = jnp.where(pos_mask, dist, -jnp.inf)
    tile_pos_max = jnp.max(pm, axis=-1, keepdims=True)                      # (T,1)
    tile_pos_arg = jnp.min(jnp.where(pm == tile_pos_max, col_g, big_f),
                           axis=-1, keepdims=True).astype(jnp.int32)        # (T,1)

    # hardest negative (min squared distance with different label)
    nm = jnp.where(neg_mask, dist, jnp.inf)
    tile_neg_min = jnp.min(nm, axis=-1, keepdims=True)
    tile_neg_arg = jnp.min(jnp.where(nm == tile_neg_min, col_g, big_f),
                           axis=-1, keepdims=True).astype(jnp.int32)

    better_pos = tile_pos_max > pos_val_sc[...]
    pos_idx_ref[...] = jnp.where(better_pos, tile_pos_arg, pos_idx_ref[...])
    pos_val_sc[...] = jnp.where(better_pos, tile_pos_max, pos_val_sc[...])

    better_neg = tile_neg_min < neg_val_sc[...]
    neg_idx_ref[...] = jnp.where(better_neg, tile_neg_arg, neg_idx_ref[...])
    neg_val_sc[...] = jnp.where(better_neg, tile_neg_min, neg_val_sc[...])


def hard_mine_pallas(embeddings, labels, t=256, matmul_dtype=jnp.float32):
    """Fused sampler: (anchor_idx, pos_idx, neg_idx) from squared pdist mining."""
    n, d = embeddings.shape
    t = min(t, _round_up(n, 128))
    n_pad = _round_up(n, t)

    e32 = embeddings.astype(jnp.float32)
    lab = labels.astype(jnp.int32)
    if n_pad != n:
        e32 = jnp.pad(e32, ((0, n_pad - n), (0, 0)))
        lab = jnp.pad(lab, (0, n_pad - n), constant_values=-1)

    sq = jnp.sum(e32 * e32, axis=1)
    row_sq = sq.reshape(n_pad, 1)
    col_sq = sq.reshape(1, n_pad)
    row_lab = lab.reshape(n_pad, 1)
    col_lab = lab.reshape(1, n_pad)
    e_mm = e32.astype(matmul_dtype)   # optionally bf16 for the MXU product

    kernel = functools.partial(_pdist_mine_kernel, n, t)
    pos_idx, neg_idx = pl.pallas_call(
        kernel,
        out_shape=(jax.ShapeDtypeStruct((n_pad, 1), jnp.int32),
                   jax.ShapeDtypeStruct((n_pad, 1), jnp.int32)),
        grid_spec=pltpu.PrefetchScalarGridSpec(
            num_scalar_prefetch=0,
            grid=(n_pad // t, n_pad // t),
            in_specs=[
                pl.BlockSpec((t, d), lambda i, j: (i, 0)),   # row tile
                pl.BlockSpec((t, d), lambda i, j: (j, 0)),   # column tile
                pl.BlockSpec((t, 1), lambda i, j: (i, 0)),   # row |e|^2
                pl.BlockSpec((1, t), lambda i, j: (0, j)),   # col |e|^2
                pl.BlockSpec((t, 1), lambda i, j: (i, 0)),   # row labels
                pl.BlockSpec((1, t), lambda i, j: (0, j)),   # col labels
            ],
            out_specs=(pl.BlockSpec((t, 1), lambda i, j: (i, 0)),
                       pl.BlockSpec((t, 1), lambda i, j: (i, 0))),
            scratch_shapes=[pltpu.VMEM((t, 1), jnp.float32),
                            pltpu.VMEM((t, 1), jnp.float32)],
        ),
        compiler_params=pltpu.CompilerParams(
            dimension_semantics=("parallel", "arbitrary"),
            vmem_limit_bytes=_VMEM_LIMIT),
    )(e_mm, e_mm, row_sq, col_sq, row_lab, col_lab)

    anchor_idx = jnp.arange(n, dtype=jnp.int32)
    return anchor_idx, pos_idx[:n, 0], neg_idx[:n, 0]


# ----------------------------------------------------------------------------
# Triplet margin loss kernel (p=2), reduction='none'; mean done in wrapper.
# ----------------------------------------------------------------------------
def _triplet_loss_kernel(margin, eps, a_ref, p_ref, n_ref, o_ref):
    a = a_ref[...]
    p = p_ref[...]
    n = n_ref[...]
    dap = a - p + eps
    dan = a - n + eps
    d_pos = jnp.sqrt(jnp.sum(dap * dap, axis=-1, keepdims=True))   # (TM, 1)
    d_neg = jnp.sqrt(jnp.sum(dan * dan, axis=-1, keepdims=True))   # (TM, 1)
    o_ref[...] = jnp.maximum(d_pos - d_neg + margin, 0.0)


def triplet_margin_loss_pallas(anchor, positive, negative,
                               margin=0.2, eps=1e-6, tm=512):
    """Per-row triplet margin loss (p=2, reduction='none'). Inputs: (M, D)."""
    m, d = anchor.shape
    tm = min(tm, _round_up(m, 8))
    m_pad = _round_up(m, tm)
    if m_pad != m:
        pad = ((0, m_pad - m), (0, 0))
        anchor = jnp.pad(anchor, pad)
        positive = jnp.pad(positive, pad)
        negative = jnp.pad(negative, pad)

    kernel = functools.partial(_triplet_loss_kernel, margin, eps)
    losses = pl.pallas_call(
        kernel,
        out_shape=jax.ShapeDtypeStruct((m_pad, 1), jnp.float32),
        grid_spec=pltpu.PrefetchScalarGridSpec(
            num_scalar_prefetch=0,
            grid=(m_pad // tm,),
            in_specs=[
                pl.BlockSpec((tm, d), lambda i: (i, 0)),
                pl.BlockSpec((tm, d), lambda i: (i, 0)),
                pl.BlockSpec((tm, d), lambda i: (i, 0)),
            ],
            out_specs=pl.BlockSpec((tm, 1), lambda i: (i, 0)),
        ),
        compiler_params=pltpu.CompilerParams(
            dimension_semantics=("parallel",),   # megacore-friendly on v7x
            vmem_limit_bytes=_VMEM_LIMIT),
    )(anchor, positive, negative)
    return losses[:m, 0]


# ----------------------------------------------------------------------------
# Module forward: _Triplet(p=2, margin=0.2, reduce=True, size_average=True).
# ----------------------------------------------------------------------------
def triplet_forward(embeddings, labels, p=2, margin=0.2,
                    reduce=True, size_average=True):
    assert p == 2, "only p=2 is kernelized"
    _anchor_idx, pos_idx, neg_idx = hard_mine_pallas(embeddings, labels)
    anchor = embeddings                      # anchor_idx is the identity permutation
    positive = jnp.take(embeddings, pos_idx, axis=0)
    negative = jnp.take(embeddings, neg_idx, axis=0)
    loss = triplet_margin_loss_pallas(anchor, positive, negative, margin=margin)
    if not reduce:
        return loss
    return loss.mean() if size_average else loss.sum()


# ----------------------------------------------------------------------------
# Pure-JAX references (verification only).
# ----------------------------------------------------------------------------
def pdist_reference(e, squared=False, eps=1e-12):
    esq = jnp.sum(e * e, axis=1)
    prod = e @ e.T
    res = jnp.maximum(esq[:, None] + esq[None, :] - 2.0 * prod, eps)
    if not squared:
        res = jnp.sqrt(res)
    return res * (1.0 - jnp.eye(e.shape[0], dtype=res.dtype))


def triplet_loss_rows_reference(a, p, n, margin=0.2, eps=1e-6):
    d_pos = jnp.sqrt(jnp.sum((a - p + eps) ** 2, axis=1))
    d_neg = jnp.sqrt(jnp.sum((a - n + eps) ** 2, axis=1))
    return jnp.maximum(d_pos - d_neg + margin, 0.0)


if __name__ == "__main__":
    key = jax.random.PRNGKey(0)
    ke, kl = jax.random.split(key)

    N, D, NUM_CLASSES = 128, 64, 8
    embeddings = jax.random.normal(ke, (N, D), jnp.float32)
    labels = jax.random.permutation(
        kl, jnp.arange(N, dtype=jnp.int32) % NUM_CLASSES)

    # --- 1) pdist kernel vs reference ---
    d_pallas = jax.block_until_ready(pdist_pallas(embeddings, squared=True))
    d_ref = pdist_reference(embeddings, squared=True)
    assert jnp.allclose(d_pallas, d_ref, atol=1e-3, rtol=1e-3), \
        float(jnp.max(jnp.abs(d_pallas - d_ref)))

    # --- 2) fused pdist + hard-mining kernel vs reference mining ---
    ai, pi, ni = hard_mine_pallas(embeddings, labels)
    pi = jax.block_until_ready(pi)
    ni = jax.block_until_ready(ni)
    r = jnp.arange(N)
    same = labels[:, None] == labels[None, :]
    eye = jnp.eye(N, dtype=bool)
    ref_pos_val = jnp.max(jnp.where(same & ~eye, d_ref, -jnp.inf), axis=1)
    ref_neg_val = jnp.min(jnp.where(~same, d_ref, jnp.inf), axis=1)
    assert bool(jnp.all(labels[pi] == labels)) and bool(jnp.all(pi != r))
    assert bool(jnp.all(labels[ni] != labels))
    assert jnp.allclose(d_ref[r, pi], ref_pos_val, atol=1e-2, rtol=1e-3)
    assert jnp.allclose(d_ref[r, ni], ref_neg_val, atol=1e-2, rtol=1e-3)

    # --- 3) triplet-loss kernel vs reference on the mined triplets ---
    p_e = embeddings[pi]
    n_e = embeddings[ni]
    loss_rows = jax.block_until_ready(
        triplet_margin_loss_pallas(embeddings, p_e, n_e, margin=0.2))
    loss_rows_ref = triplet_loss_rows_reference(embeddings, p_e, n_e, margin=0.2)
    assert loss_rows.shape == (N,)
    assert jnp.allclose(loss_rows, loss_rows_ref, atol=1e-4, rtol=1e-4)

    # --- 4) full module forward (sampler + gather + loss, mean reduction) ---
    full_loss = jax.block_until_ready(triplet_forward(embeddings, labels))
    ref_pi = jnp.argmax(jnp.where(same & ~eye, d_ref, -jnp.inf), axis=1)
    ref_ni = jnp.argmin(jnp.where(~same, d_ref, jnp.inf), axis=1)
    full_loss_ref = jnp.mean(triplet_loss_rows_reference(
        embeddings, embeddings[ref_pi], embeddings[ref_ni], margin=0.2))
    assert full_loss.shape == () and bool(jnp.isfinite(full_loss))
    assert jnp.allclose(full_loss, full_loss_ref, atol=2e-3, rtol=1e-3), \
        (float(full_loss), float(full_loss_ref))

    print("KERNEL_OK")
</pallas_src>

<mosaic_0001>
module attributes {stable_mosaic.version = 11 : i64} {
  func.func @_pdist_kernel(%arg0: i32, %arg1: i32, %arg2: memref<128x64xf32, #tpu.memory_space<vmem>>, %arg3: memref<128x64xf32, #tpu.memory_space<vmem>>, %arg4: memref<128x1xf32, #tpu.memory_space<vmem>>, %arg5: memref<1x128xf32, #tpu.memory_space<vmem>>, %arg6: memref<128x128xf32, #tpu.memory_space<vmem>>) attributes {dimension_semantics = [#tpu.dimension_semantics<parallel>, #tpu.dimension_semantics<parallel>], iteration_bounds = array<i64: 1, 1>, scalar_prefetch = 0 : i64, scratch_operands = 0 : i64, tpu.core_type = #tpu.core_type<tc>, window_params = [{transform_indices = @transform_0, window_bounds = array<i64: 128, 64>}, {transform_indices = @transform_1, window_bounds = array<i64: 128, 64>}, {transform_indices = @transform_2, window_bounds = array<i64: 128, 1>}, {transform_indices = @transform_3, window_bounds = array<i64: 1, 128>}, {transform_indices = @transform_4, window_bounds = array<i64: 128, 128>}]} {
    %c0 = arith.constant 0 : index
    %c0_0 = arith.constant 0 : index
    %0 = vector.load %arg2[%c0, %c0_0] : memref<128x64xf32, #tpu.memory_space<vmem>>, vector<128x64xf32>
    %c0_1 = arith.constant 0 : index
    %c0_2 = arith.constant 0 : index
    %1 = vector.load %arg3[%c0_1, %c0_2] : memref<128x64xf32, #tpu.memory_space<vmem>>, vector<128x64xf32>
    %cst = arith.constant dense<0.000000e+00> : vector<128x128xf32>
    %2 = tpu.matmul %0, %1, %cst {dimension_numbers = #tpu.dot_dimension_numbers<[1], [1], [0], [0], [0, 0, 1, 0], [], []>} : vector<128x64xf32>, vector<128x64xf32>, vector<128x128xf32> -> vector<128x128xf32>
    %c0_3 = arith.constant 0 : index
    %c0_4 = arith.constant 0 : index
    %3 = vector.load %arg4[%c0_3, %c0_4] : memref<128x1xf32, #tpu.memory_space<vmem>>, vector<128x1xf32>
    %c0_5 = arith.constant 0 : index
    %c0_6 = arith.constant 0 : index
    %4 = vector.load %arg5[%c0_5, %c0_6] : memref<1x128xf32, #tpu.memory_space<vmem>>, vector<1x128xf32>
    %5 = vector.broadcast %3 : vector<128x1xf32> to vector<128x128xf32>
    %6 = vector.broadcast %4 : vector<1x128xf32> to vector<128x128xf32>
    %7 = arith.addf %5, %6 : vector<128x128xf32>
    %cst_7 = arith.constant 2.000000e+00 : f32
    %8 = vector.broadcast %cst_7 : f32 to vector<128x128xf32>
    %9 = arith.mulf %8, %2 : vector<128x128xf32>
    %10 = arith.subf %7, %9 : vector<128x128xf32>
    %cst_8 = arith.constant 9.99999996E-13 : f32
    %11 = vector.broadcast %cst_8 : f32 to vector<128x128xf32>
    %12 = arith.maximumf %10, %11 : vector<128x128xf32>
    %13 = arith.cmpi ne, %arg0, %arg1 : i32
    %14 = arith.extui %13 : i1 to i32
    %c0_i32 = arith.constant 0 : i32
    %15 = arith.cmpi ne, %14, %c0_i32 : i32
    scf.if %15 {
      %c0_10 = arith.constant 0 : index
      %c0_11 = arith.constant 0 : index
      %19 = vector.load %arg6[%c0_10, %c0_11] : memref<128x128xf32, #tpu.memory_space<vmem>>, vector<128x128xf32>
      tpu.vector_store %arg6[%c0_10, %c0_11], %12 {strides = array<i32>} : memref<128x128xf32, #tpu.memory_space<vmem>>, vector<128x128xf32>,
    } else {
    }
    %16 = arith.cmpi eq, %arg0, %arg1 : i32
    %17 = arith.extui %16 : i1 to i32
    %c0_i32_9 = arith.constant 0 : i32
    %18 = arith.cmpi ne, %17, %c0_i32_9 : i32
    scf.if %18 {
      %19 = tpu.iota {dimensions = array<i32: 0>} : vector<128x128xi32>
      %c128_i32 = arith.constant 128 : i32
      %20 = arith.muli %arg0, %c128_i32 : i32
      %21 = vector.broadcast %20 : i32 to vector<128x128xi32>
      %22 = arith.addi %19, %21 : vector<128x128xi32>
      %23 = tpu.iota {dimensions = array<i32: 1>} : vector<128x128xi32>
      %c128_i32_10 = arith.constant 128 : i32
      %24 = arith.muli %arg1, %c128_i32_10 : i32
      %25 = vector.broadcast %24 : i32 to vector<128x128xi32>
      %26 = arith.addi %23, %25 : vector<128x128xi32>
      %27 = arith.cmpi eq, %22, %26 : vector<128x128xi32>
      %cst_11 = arith.constant 0.000000e+00 : f32
      %28 = vector.broadcast %cst_11 : f32 to vector<128x128xf32>
      %29 = arith.select %27, %28, %12 : vector<128x128xi1>, vector<128x128xf32>
      %c0_12 = arith.constant 0 : index
      %c0_13 = arith.constant 0 : index
      %30 = vector.load %arg6[%c0_12, %c0_13] : memref<128x128xf32, #tpu.memory_space<vmem>>, vector<128x128xf32>
      tpu.vector_store %arg6[%c0_12, %c0_13], %29 {strides = array<i32>} : memref<128x128xf32, #tpu.memory_space<vmem>>, vector<128x128xf32>,
    } else {
    }
    return
  }
  func.func @transform_0(%arg0: i32, %arg1: i32) -> (i32, i32) {
    %c0_i32 = arith.constant 0 : i32
    %c0_i32_0 = arith.constant 0 : i32
    return %arg0, %c0_i32 : i32, i32
  }
  func.func @transform_1(%arg0: i32, %arg1: i32) -> (i32, i32) {
    %c0_i32 = arith.constant 0 : i32
    %c0_i32_0 = arith.constant 0 : i32
    return %arg1, %c0_i32 : i32, i32
  }
  func.func @transform_2(%arg0: i32, %arg1: i32) -> (i32, i32) {
    %c0_i32 = arith.constant 0 : i32
    %c0_i32_0 = arith.constant 0 : i32
    return %arg0, %c0_i32 : i32, i32
  }
  func.func @transform_3(%arg0: i32, %arg1: i32) -> (i32, i32) {
    %c0_i32 = arith.constant 0 : i32
    %c0_i32_0 = arith.constant 0 : i32
    return %c0_i32, %arg1 : i32, i32
  }
  func.func @transform_4(%arg0: i32, %arg1: i32) -> (i32, i32) {
    %c0_i32 = arith.constant 0 : i32
    return %arg0, %arg1 : i32, i32
  }
}

</mosaic_0001>

<bundles_post_ra>
// kernel: tpu_custom_call.1
= control target key start
LH: loop header
LB: loop body
LE: loop exit
PB: predicated region body
PF: predicated region fallthrough
CT: control target
= control target key end

     0   :  { %9 = vsyncpa [#allocation3], 0  ;;  %s1319_s0 = inlined_call_operand.hbm [shape: f32[128,64], index: 0, kind: input, shape index: {}]   ;;  %s1320_s1 = inlined_call_operand.hbm [shape: f32[128,64], index: 1, kind: input, shape index: {}]   ;;  %s1321_s2 = inlined_call_operand.hbm [shape: f32[128,1], index: 2, kind: input, shape index: {}]   ;;  %s1322_s3 = inlined_call_operand.hbm [shape: f32[1,128], index: 3, kind: input, shape index: {}]   ;;  %s1323_s4 = inlined_call_operand.hbm [shape: f32[128,128], index: 4, kind: output, shape index: {}]  }
   0x1   :  { %10 = vsyncpa [#allocation6], 0 }
   0x2   :  { %11 = vsyncpa [#allocation9], 0 }
   0x3   :  { %12 = vsyncpa [#allocation4], 0  ;;  %s956_s15 = smov [#allocation5]   ;;  %s957_s17 = smov [#allocation2]  }
   0x4   :  { %s30_s16 = sshll.u32 %s956_s15, 4  ;;  %s18_s18 = sshll.u32 %s957_s17, 4  ;;  %s31_s16 = int_to_ptr.vmem [resolvable:$true] %s30_s16  ;;  %s989_s18 = int_to_ptr.vmem [resolvable:$true] %s18_s18 }
   0x5   :  { %s838_s21 = scalar_lea.hbm %s1320_s1, 2048 }
   0x6   :  { %p839_p0 = scmp.ne.s32.totalorder %s1320_s1, %s838_s21  ;;  %p842_p1 = scmp.lt.u32.totalorder %s838_s21, %s1320_s1 }
   0x8   :  { %p844_p2 = pnand %p842_p1, %p839_p0 }
   0xa   :  { %847 = shalt.err (!%p844_p2)
}
   0xb   :  { %s848_s26 = scalar_lea.vmem %s31_s16, 2048  ;;  %p853_p4 = scmp.lt.s32.totalorder %s31_s16, %s31_s16 }
   0xc   :  { %p849_p3 = scmp.ne.s32.totalorder %s31_s16, %s848_s26  ;;  %p854_p5 = scmp.lt.s32.totalorder %s848_s26, %s848_s26 }
   0xe   :  { %p855_p6 = por %p854_p5, %p853_p4 }
  0x10   :  { %p856_p7 = pnand %p855_p6, %p849_p3 }
  0x12   :  { %859 = shalt.err (!%p856_p7)
}
  0x13   :  { %s958_s27 = smov 128   ;;  %s959_s28 = smov 8  }
  0x14   :  { %36 = dma.hbm_to_vmem [thread:$0]  %s1320_s1, 2048, %s31_s16, [#allocation6], %s958_s27, %s958_s27, %s959_s28  }
  0x15   :  { %s860_s7 = scalar_lea.hbm %s1319_s0, 2048 }
  0x16   :  { %p861_p8 = scmp.ne.s32.totalorder %s1319_s0, %s860_s7  ;;  %p864_p9 = scmp.lt.u32.totalorder %s860_s7, %s1319_s0 }
  0x18   :  { %p866_p10 = pnand %p864_p9, %p861_p8 }
  0x1a   :  { %869 = shalt.err (!%p866_p10)
}
  0x1b   :  { %s870_s12 = scalar_lea.vmem %s989_s18, 2048  ;;  %p875_p12 = scmp.lt.s32.totalorder %s989_s18, %s989_s18 }
  0x1c   :  { %p871_p11 = scmp.ne.s32.totalorder %s989_s18, %s870_s12  ;;  %p876_p13 = scmp.lt.s32.totalorder %s870_s12, %s870_s12 }
  0x1e   :  { %p877_p0 = por %p876_p13, %p875_p12 }
  0x20   :  { %p878_p1 = pnand %p877_p0, %p871_p11 }
  0x22   :  { %881 = shalt.err (!%p878_p1)
}
  0x23   :  { %24 = dma.hbm_to_vmem [thread:$0]  %s1319_s0, 2048, %s989_s18, [#allocation3], %s958_s27, %s958_s27, %s959_s28  }
  0x24   :  { %s960_s14 = smov [#allocation7]   ;;  %s961_s16 = smov [#allocation8]  }
  0x25   :  { %s42_s15 = sshll.u32 %s960_s14, 4  ;;  %s55_s17 = sshll.u32 %s961_s16, 4  ;;  %s43_s15 = int_to_ptr.vmem [resolvable:$true] %s42_s15  ;;  %s56_s17 = int_to_ptr.vmem [resolvable:$true] %s55_s17 }
  0x26   :  { %s882_s21 = scalar_lea.hbm %s1321_s2, 2048 }
  0x27   :  { %p883_p2 = scmp.ne.s32.totalorder %s1321_s2, %s882_s21  ;;  %p886_p3 = scmp.lt.u32.totalorder %s882_s21, %s1321_s2 }
  0x29   :  { %p888_p4 = pnand %p886_p3, %p883_p2 }
  0x2b   :  { %891 = shalt.err (!%p888_p4)
}
  0x2c   :  { %s892_s0 = scalar_lea.vmem %s43_s15, 2048  ;;  %p897_p6 = scmp.lt.s32.totalorder %s43_s15, %s43_s15 }
  0x2d   :  { %p893_p5 = scmp.ne.s32.totalorder %s43_s15, %s892_s0  ;;  %p898_p7 = scmp.lt.s32.totalorder %s892_s0, %s892_s0 }
  0x2f   :  { %p899_p8 = por %p898_p7, %p897_p6 }
  0x31   :  { %p900_p9 = pnand %p899_p8, %p893_p5 }
  0x33   :  { %903 = shalt.err (!%p900_p9)
}
  0x34   :  { %48 = dma.hbm_to_vmem [thread:$0]  %s1321_s2, 2048, %s43_s15, [#allocation6], %s958_s27, %s958_s27, %s959_s28  }
  0x35   :  { %s904_s5 = scalar_lea.hbm %s1322_s3, 16 }
  0x36   :  { %p905_p10 = scmp.ne.s32.totalorder %s1322_s3, %s904_s5  ;;  %p908_p11 = scmp.lt.u32.totalorder %s904_s5, %s1322_s3 }
  0x38   :  { %p910_p12 = pnand %p908_p11, %p905_p10 }
  0x3a   :  { %913 = shalt.err (!%p910_p12)
}
  0x3b   :  { %s914_s10 = scalar_lea.vmem %s56_s17, 16  ;;  %s918_s11 = scalar_lea.vmem %s56_s17, 32 }
  0x3c   :  { %p915_p13 = scmp.ne.s32.totalorder %s56_s17, %s914_s10  ;;  %p919_p0 = scmp.lt.s32.totalorder %s56_s17, %s56_s17 }
  0x3d   :  { %p920_p1 = scmp.lt.s32.totalorder %s918_s11, %s914_s10 }
  0x3f   :  { %p921_p2 = por %p920_p1, %p919_p0 }
  0x41   :  { %p922_p3 = pnand %p921_p2, %p915_p13 }
  0x43   :  { %925 = shalt.err (!%p922_p3)
}
  0x44   :  { %58 = dma.hbm_to_vmem [thread:$0]  %s1322_s3, 16, %s56_s17, [#allocation9]  }
  0x45   :  { %948 = dma.done.wait [#allocation3], 2048  }
  0x46   :  { %949 = vsyncadd [#allocation3], 4294965248 }
  0x47   :  { %950 = dma.done.wait [#allocation6], 4096  }
  0x48   :  { %951 = vsyncadd [#allocation6], 4294963200 }
  0x49   :  { %952 = dma.done.wait [#allocation9], 16  }
  0x4a   :  { %953 = vsyncadd [#allocation9], 4294967280  ;;  %v962_v0 = vmov 0   ;;  %vm103_vm0 = vcmask 523264   ;;  %v87_v2 = vld [vmem:[#allocation5] sm:$0xff]  ;;  %v88_v3 = vld [vmem:[#allocation5 + $0x8] sm:$0xff] }
  0x4b   :  { %837 = vset.pattern.permute.xlu1 %v962_v0  ;;  %836 = vset.pattern.permute.xlu0 %v962_v0  ;;  %vm1055_vm1 = vmpackc.low %vm103_vm0, %vm103_vm0  ;;  %v89_v4 = vld [vmem:[#allocation5 + $0x10] sm:$0xff]  ;;  %v764_v5 = vpack.c.bf16 %v88_v3, %v87_v2  ;;  %v90_v6 = vld [vmem:[#allocation5 + $0x18] sm:$0xff]  ;;  %v536_v3 = vlaneseq  ;;  %s963_s3 = smov [#allocation10]  }
  0x4c   :  { %v770_v7 = vpack.c.bf16 %v90_v6, %v89_v4  ;;  %v71_v8 = vld [vmem:[#allocation2] sm:$0xff]  ;;  %v92_v11 = vld [vmem:[#allocation5 + $0x28] sm:$0xff]  ;;  %v347_v13 = vld [vmem:[#allocation7 + $0x10] sm:$0xff]  ;;  %s629_s1 = sshll.u32 %s963_s3, 4  ;;  %s630_s1 = int_to_ptr.vmem [resolvable:$true] %s629_s1 }
  0x4d   :  { %766 = vmatprep.subr.msk.bf16.mxu0 %vm1055_vm1, %v764_v5  ;;  %812 = vmatprep.subr.msk.bf16.mxu1 %vm1055_vm1, %v764_v5  ;;  %v79_v9 = vld [vmem:[#allocation2 + $0x40] sm:$0xff]  ;;  %v348_v15 = vld [vmem:[#allocation7 + $0x18] sm:$0xff]  ;;  %v93_v16 = vld [vmem:[#allocation5 + $0x30] sm:$0xff]  ;;  %s926_s13 = scalar_lea.vmem %s630_s1, 2048  ;;  %p931_p5 = scmp.lt.s32.totalorder %s630_s1, %s630_s1 }
  0x4e   :  { %769 = vmatpush3.bf16.xpose.msk.msra.mxu0 %vm1055_vm1, %v764_v5  ;;  %820 = vmatpush3.bf16.xpose.msk.msra.mxu1 %vm1055_vm1, %v764_v5  ;;  %v91_v10 = vld [vmem:[#allocation5 + $0x20] sm:$0xff]  ;;  %v94_v17 = vld [vmem:[#allocation5 + $0x38] sm:$0xff]  ;;  %v346_v18 = vld [vmem:[#allocation7 + $0x8] sm:$0xff]  ;;  %v1139_v5 = vshrl.u32 %v536_v3, 7  ;;  %p927_p4 = scmp.ne.s32.totalorder %s630_s1, %s926_s13  ;;  %p932_p6 = scmp.lt.s32.totalorder %s926_s13, %s926_s13 }
  0x4f   :  { %772 = vmatprep.subr.msk.bf16.mxu0 %vm1055_vm1, %v770_v7  ;;  %813 = vmatprep.subr.msk.bf16.mxu1 %vm1055_vm1, %v770_v7  ;;  %v776_v12 = vpack.c.bf16 %v92_v11, %v91_v10  ;;  %v345_v14 = vld [vmem:[#allocation7] sm:$0xff]  ;;  %v350_v19 = vld [vmem:[#allocation7 + $0x28] sm:$0xff]  ;;  %v782_v20 = vpack.c.bf16 %v94_v17, %v93_v16  ;;  %v352_v22 = vld [vmem:[#allocation7 + $0x38] sm:$0xff] }
  0x50   :  { %740 = vmatprep.mubr.msk.f32.mxu0 %vm103_vm0, %v71_v8  ;;  %752 = vmatprep.mubr.msk.f32.mxu1 %vm103_vm0, %v79_v9  ;;  %v349_v21 = vld [vmem:[#allocation7 + $0x20] sm:$0xff]  ;;  %v96_v24 = vld [vmem:[#allocation5 + $0x48] sm:$0xff]  ;;  %v351_v25 = vld [vmem:[#allocation7 + $0x30] sm:$0xff]  ;;  %v1144_v8 = vadd.s32 8, %v1139_v5  ;;  %v1146_v9 = vand.u32 127, %v536_v3  ;;  %v1149_v10 = vadd.s32 72, %v1139_v5  ;;  %p933_p7 = por %p932_p6, %p931_p5 }
  0x51   :  { %374 = vperm.xlu1 %837, %v347_v13   ;;  %364 = vperm.xlu0 %836, %v345_v14   ;;  %v95_v23 = vld [vmem:[#allocation5 + $0x40] sm:$0xff]  ;;  %v354_v26 = vld [vmem:[#allocation7 + $0x48] sm:$0xff]  ;;  %v356_v29 = vld [vmem:[#allocation7 + $0x58] sm:$0xff]  ;;  %v1156_v13 = vadd.s32 64, %v1139_v5  ;;  %v1163_v17 = vadd.s32 24, %v1139_v5 }
  0x52   :  { %v788_v27 = vpack.c.bf16 %v96_v24, %v95_v23  ;;  %v353_v28 = vld [vmem:[#allocation7 + $0x40] sm:$0xff]  ;;  %v97_v30 = vld [vmem:[#allocation5 + $0x50] sm:$0xff]  ;;  %v98_v31 = vld [vmem:[#allocation5 + $0x58] sm:$0xff]  ;;  %vm577_vm2 = vcmp.eq.s32.totalorder %v1144_v8, %v1146_v9  ;;  %vm585_vm3 = vcmp.eq.s32.totalorder %v1149_v10, %v1146_v9  ;;  %vm576_vm4 = vcmp.eq.s32.totalorder %v1139_v5, %v1146_v9  ;;  %p934_p8 = pnand %p933_p7, %p927_p4 }
  0x53   :  { %v355_v32 = vld [vmem:[#allocation7 + $0x50] sm:$0xff]  ;;  %v358_v33 = vld [vmem:[#allocation7 + $0x68] sm:$0xff]  ;;  %v794_v34 = vpack.c.bf16 %v98_v31, %v97_v30  ;;  %v357_v35 = vld [vmem:[#allocation7 + $0x60] sm:$0xff]  ;;  %vm584_vm5 = vcmp.eq.s32.totalorder %v1156_v13, %v1146_v9  ;;  %vm579_vm6 = vcmp.eq.s32.totalorder %v1163_v17, %v1146_v9  ;;  %v1202_v31 = vadd.s32 40, %v1139_v5 }
  0x54   :  { %v360_v36 = vld [vmem:[#allocation7 + $0x78] sm:$0xff]  ;;  %v99_v37 = vld [vmem:[#allocation5 + $0x60] sm:$0xff]  ;;  %v100_v38 = vld [vmem:[#allocation5 + $0x68] sm:$0xff]  ;;  %v543_v13 = vadd.s32 48, %v1139_v5 }
  0x55   :  { %379 = vperm.xlu1 %837, %v348_v15   ;;  %369 = vperm.xlu0 %836, %v346_v18   ;;  %v359_v39 = vld [vmem:[#allocation7 + $0x70] sm:$0xff]  ;;  %v800_v40 = vpack.c.bf16 %v100_v38, %v99_v37  ;;  %v102_v42 = vld [vmem:[#allocation5 + $0x78] sm:$0xff]  ;;  %v72_v44 = vld [vmem:[#allocation2 + $0x8] sm:$0xff]  ;;  %v1166_v18 = vadd.s32 88, %v1139_v5  ;;  %vm581_vm10 = vcmp.eq.s32.totalorder %v1202_v31, %v1146_v9 }
  0x56   :  { %775 = vmatpush3.bf16.xpose.msk.msra.mxu0 %vm1055_vm1, %v770_v7  ;;  %821 = vmatpush3.bf16.xpose.msk.msra.mxu1 %vm1055_vm1, %v770_v7  ;;  %v101_v41 = vld [vmem:[#allocation5 + $0x70] sm:$0xff]  ;;  %v80_v45 = vld [vmem:[#allocation2 + $0x48] sm:$0xff]  ;;  %v74_v48 = vld [vmem:[#allocation2 + $0x18] sm:$0xff] }
  0x57   :  { %778 = vmatprep.subr.msk.bf16.mxu0 %vm1055_vm1, %v776_v12  ;;  %814 = vmatprep.subr.msk.bf16.mxu1 %vm1055_vm1, %v776_v12  ;;  %v806_v43 = vpack.c.bf16 %v102_v42, %v101_v41  ;;  %v73_v46 = vld [vmem:[#allocation2 + $0x10] sm:$0xff]  ;;  %v82_v49 = vld [vmem:[#allocation2 + $0x58] sm:$0xff]  ;;  %v75_v50 = vld [vmem:[#allocation2 + $0x20] sm:$0xff]  ;;  %vm587_vm7 = vcmp.eq.s32.totalorder %v1166_v18, %v1146_v9  ;;  %v1211_v41 = vadd.s32 104, %v1139_v5  ;;  %v1214_v42 = vadd.s32 32, %v1139_v5 }
  0x58   :  { %v81_v47 = vld [vmem:[#allocation2 + $0x50] sm:$0xff]  ;;  %v83_v51 = vld [vmem:[#allocation2 + $0x60] sm:$0xff]  ;;  %v76_v52 = vld [vmem:[#allocation2 + $0x28] sm:$0xff] }
  0x59   :  { %389 = vperm.xlu1 %837, %v350_v19   ;;  %384 = vperm.xlu0 %836, %v349_v21   ;;  %v84_v53 = vld [vmem:[#allocation2 + $0x68] sm:$0xff]  ;;  %v77_v54 = vld [vmem:[#allocation2 + $0x30] sm:$0xff]  ;;  %v78_v56 = vld [vmem:[#allocation2 + $0x38] sm:$0xff]  ;;  %vm589_vm11 = vcmp.eq.s32.totalorder %v1211_v41, %v1146_v9  ;;  %vm580_vm12 = vcmp.eq.s32.totalorder %v1214_v42, %v1146_v9 }
  0x5a   :  { %v85_v55 = vld [vmem:[#allocation2 + $0x70] sm:$0xff]  ;;  %v86_v57 = vld [vmem:[#allocation2 + $0x78] sm:$0xff]  ;;  %v1141_v7 = vld [vmem:[#allocation8] ss:$0 sm:$0xff] }
  0x5d   :  { %399 = vperm.xlu1 %837, %v352_v22   ;;  %394 = vperm.xlu0 %836, %v351_v25  }
  0x5e   :  { %781 = vmatpush3.bf16.xpose.msk.msra.mxu0 %vm1055_vm1, %v776_v12  ;;  %822 = vmatpush3.bf16.xpose.msk.msra.mxu1 %vm1055_vm1, %v776_v12 }
  0x5f   :  { %784 = vmatprep.subr.msk.bf16.mxu0 %vm1055_vm1, %v782_v20  ;;  %815 = vmatprep.subr.msk.bf16.mxu1 %vm1055_vm1, %v782_v20 }
  0x61   :  { %409 = vperm.xlu1 %837, %v354_v26   ;;  %404 = vperm.xlu0 %836, %v353_v28   ;;  %v1191_v26 = vadd.s32 16, %v1139_v5 }
  0x63   :  { %vm578_vm8 = vcmp.eq.s32.totalorder %v1191_v26, %v1146_v9 }
  0x65   :  { %419 = vperm.xlu1 %837, %v356_v29   ;;  %414 = vperm.xlu0 %836, %v355_v32  }
  0x66   :  { %787 = vmatpush3.bf16.xpose.msk.msra.mxu0 %vm1055_vm1, %v782_v20  ;;  %823 = vmatpush3.bf16.xpose.msk.msra.mxu1 %vm1055_vm1, %v782_v20 }
  0x67   :  { %790 = vmatprep.subr.msk.bf16.mxu0 %vm1055_vm1, %v788_v27  ;;  %816 = vmatprep.subr.msk.bf16.mxu1 %vm1055_vm1, %v788_v27 }
  0x69   :  { %429 = vperm.xlu1 %837, %v358_v33   ;;  %424 = vperm.xlu0 %836, %v357_v35  }
  0x6d   :  { %439 = vperm.xlu1 %837, %v360_v36   ;;  %434 = vperm.xlu0 %836, %v359_v39  }
  0x6e   :  { %793 = vmatpush3.bf16.xpose.msk.msra.mxu0 %vm1055_vm1, %v788_v27  ;;  %824 = vmatpush3.bf16.xpose.msk.msra.mxu1 %vm1055_vm1, %v788_v27  ;;  %v1194_v27 = vadd.s32 80, %v1139_v5 }
  0x6f   :  { %796 = vmatprep.subr.msk.bf16.mxu0 %vm1055_vm1, %v794_v34  ;;  %817 = vmatprep.subr.msk.bf16.mxu1 %vm1055_vm1, %v794_v34 }
  0x70   :  { %vm586_vm9 = vcmp.eq.s32.totalorder %v1194_v27, %v1146_v9 }
  0x76   :  { %799 = vmatpush3.bf16.xpose.msk.msra.mxu0 %vm1055_vm1, %v794_v34  ;;  %825 = vmatpush3.bf16.xpose.msk.msra.mxu1 %vm1055_vm1, %v794_v34 }
  0x77   :  { %802 = vmatprep.subr.msk.bf16.mxu0 %vm1055_vm1, %v800_v40  ;;  %818 = vmatprep.subr.msk.bf16.mxu1 %vm1055_vm1, %v800_v40 }
  0x7e   :  { %805 = vmatpush3.bf16.xpose.msk.msra.mxu0 %vm1055_vm1, %v800_v40  ;;  %826 = vmatpush3.bf16.xpose.msk.msra.mxu1 %vm1055_vm1, %v800_v40 }
  0x7f   :  { %808 = vmatprep.subr.msk.bf16.mxu0 %vm1055_vm1, %v806_v43  ;;  %819 = vmatprep.subr.msk.bf16.mxu1 %vm1055_vm1, %v806_v43 }
  0x86   :  { %811 = vmatpush3.bf16.xpose.msk.msra.mxu0 %vm1055_vm1, %v806_v43  ;;  %827 = vmatpush3.bf16.xpose.msk.msra.mxu1 %vm1055_vm1, %v806_v43 }
  0x8d   :  { %741 = vmatmul.mubr.msk.f32.vlgmr.msra.gmra.mrb[0].mxu0 %vm103_vm0, %v72_v44  ;;  %753 = vmatmul.mubr.msk.f32.vlgmr.msra.gmra.mrb[0].mxu1 %vm103_vm0, %v80_v45 }
  0x8e   :  { %743 = vmatprep.mubr.msk.f32.mxu0 %vm103_vm0, %v73_v46  ;;  %755 = vmatprep.mubr.msk.f32.mxu1 %vm103_vm0, %v81_v47  ;;  %v1224_v47 = vadd.s32 96, %v1139_v5 }
  0x90   :  { %vm588_vm13 = vcmp.eq.s32.totalorder %v1224_v47, %v1146_v9 }
  0x91   :  { %744 = vmatmul.mubr.msk.f32.gmra.mrb[2].mxu0 %vm103_vm0, %v74_v48  ;;  %756 = vmatmul.mubr.msk.f32.gmra.mrb[2].mxu1 %vm103_vm0, %v82_v49 }
  0x92   :  { %746 = vmatprep.mubr.msk.f32.mxu0 %vm103_vm0, %v75_v50  ;;  %758 = vmatprep.mubr.msk.f32.mxu1 %vm103_vm0, %v83_v51 }
  0x95   :  { %747 = vmatmul.mubr.msk.f32.gmra.mrb[4].mxu0 %vm103_vm0, %v76_v52  ;;  %759 = vmatmul.mubr.msk.f32.gmra.mrb[4].mxu1 %vm103_vm0, %v84_v53  ;;  %v1229_v52 = vadd.s32 56, %v1139_v5  ;;  %v1232_v53 = vadd.s32 120, %v1139_v5 }
  0x96   :  { %749 = vmatprep.mubr.msk.f32.mxu0 %vm103_vm0, %v77_v54  ;;  %761 = vmatprep.mubr.msk.f32.mxu1 %vm103_vm0, %v85_v55 }
  0x97   :  { %vm583_vm14 = vcmp.eq.s32.totalorder %v1229_v52, %v1146_v9  ;;  %vm591_vm15 = vcmp.eq.s32.totalorder %v1232_v53, %v1146_v9 }
  0x99   :  { %750 = vmatmul.mubr.msk.f32.gmra.mrb[6].mxu0 %vm103_vm0, %v78_v56  ;;  %762 = vmatmul.mubr.msk.f32.gmra.mrb[6].mxu1 %vm103_vm0, %v86_v57  ;;  %vm582_vm0 = vcmp.eq.s32.totalorder %v543_v13, %v1146_v9 }
  0xd0   :  { %v375_v58 = vpop.permute.xlu1 %374  ;;  %v365_v59 = vpop.permute.xlu0 %364 }
  0xd1   :  { %v1152_v11 = vadd.f32 %v1141_v7, %v375_v58  ;;  %v448_v12 = vadd.f32 %v1141_v7, %v365_v59 }
  0xd4   :  { %v380_v60 = vpop.permute.xlu1 %379  ;;  %v370_v61 = vpop.permute.xlu0 %369 }
  0xd5   :  { %v1159_v14 = vadd.f32 %v1141_v7, %v380_v60  ;;  %v449_v15 = vadd.f32 %v1141_v7, %v370_v61 }
  0xd8   :  { %v390_v62 = vpop.permute.xlu1 %389  ;;  %v385_v63 = vpop.permute.xlu0 %384 }
  0xd9   :  { %v1169_v19 = vadd.f32 %v1141_v7, %v390_v62  ;;  %v1172_v20 = vadd.f32 %v1141_v7, %v385_v63 }
  0xdc   :  { %v400_v0 = vpop.permute.xlu1 %399  ;;  %v395_v1 = vpop.permute.xlu0 %394 }
  0xdd   :  { %v1175_v21 = vadd.f32 %v1141_v7, %v400_v0  ;;  %v1178_v22 = vadd.f32 %v1141_v7, %v395_v1 }
  0xe0   :  { %v410_v2 = vpop.permute.xlu1 %409  ;;  %v405_v4 = vpop.permute.xlu0 %404 }
  0xe1   :  { %v457_v24 = vadd.f32 %v1141_v7, %v410_v2  ;;  %v456_v25 = vadd.f32 %v1141_v7, %v405_v4 }
  0xe4   :  { %v420_v6 = vpop.permute.xlu1 %419  ;;  %v415_v16 = vpop.permute.xlu0 %414 }
  0xe5   :  { %v459_v28 = vadd.f32 %v1141_v7, %v420_v6  ;;  %v1205_v32 = vadd.f32 %v1141_v7, %v415_v16 }
  0xe8   :  { %v430_v23 = vpop.permute.xlu1 %429  ;;  %v425_v38 = vpop.permute.xlu0 %424 }
  0xe9   :  { %v1208_v33 = vadd.f32 %v1141_v7, %v430_v23  ;;  %v1217_v43 = vadd.f32 %v1141_v7, %v425_v38 }
  0xec   :  { %v440_v44 = vpop.permute.xlu1 %439 }
  0xed   :  { %v1235_v58 = vadd.f32 %v1141_v7, %v440_v44 }
 0x160   :  { %v742_v29 = vpop.f32.mrb[0].mxu0  ;;  %v754_v30 = vpop.f32.mrb[0].mxu1 }
 0x161   :  { %v465_v34 = vmul.f32 2.0, %v742_v29  ;;  %v473_v35 = vmul.f32 2.0, %v754_v30  ;;  %v266_v36 = vpop.f32.mrb[1].mxu0  ;;  %v306_v37 = vpop.f32.mrb[1].mxu1 }
 0x162   :  { %v464_v39 = vmul.f32 2.0, %v266_v36  ;;  %v472_v40 = vmul.f32 2.0, %v306_v37 }
 0x163   :  { %v481_v45 = vsub.f32 %v449_v15, %v465_v34  ;;  %v489_v46 = vsub.f32 %v457_v24, %v473_v35  ;;  %v435_v15 = vpop.permute.xlu0 %434  ;;  %v551_v34 = vadd.s32 112, %v1139_v5 }
 0x164   :  { %v480_v48 = vsub.f32 %v448_v12, %v464_v39  ;;  %v488_v49 = vsub.f32 %v456_v25, %v472_v40  ;;  %v745_v50 = vpop.f32.mrb[2].mxu0  ;;  %v757_v51 = vpop.f32.mrb[2].mxu1  ;;  %v462_v5 = vadd.f32 %v1141_v7, %v435_v15 }
 0x165   :  { %v497_v54 = vmax.f32 %v481_v45, 1e-12  ;;  %v505_v55 = vmax.f32 %v489_v46, 1e-12  ;;  %v467_v56 = vmul.f32 2.0, %v745_v50  ;;  %v475_v57 = vmul.f32 2.0, %v757_v51 }
 0x166   :  { %v496_v59 = vmax.f32 %v480_v48, 1e-12  ;;  %v504_v60 = vmax.f32 %v488_v49, 1e-12  ;;  %v276_v61 = vpop.f32.mrb[3].mxu0  ;;  %v316_v62 = vpop.f32.mrb[3].mxu1  ;;  %vm590_vm1 = vcmp.eq.s32.totalorder %v551_v34, %v1146_v9 }
 0x167   :  { %v593_v63 = vsel %vm577_vm2, 0.0, %v497_v54  ;;  %v601_v0 = vsel %vm585_vm3, 0.0, %v505_v55  ;;  %v483_v1 = vsub.f32 %v1159_v14, %v467_v56  ;;  %v491_v2 = vsub.f32 %v459_v28, %v475_v57 }
 0x168   :  { %609 = vst [vmem:[#allocation10 + $0x8] sm:$0xff] %v593_v63  ;;  %617 = vst [vmem:[#allocation10 + $0x48] sm:$0xff] %v601_v0  ;;  %v592_v3 = vsel %vm576_vm4, 0.0, %v496_v59  ;;  %v600_v4 = vsel %vm584_vm5, 0.0, %v504_v60  ;;  %v466_v6 = vmul.f32 2.0, %v276_v61  ;;  %v474_v8 = vmul.f32 2.0, %v316_v62 }
 0x169   :  { %v748_v10 = vpop.f32.mrb[4].mxu0  ;;  %v760_v12 = vpop.f32.mrb[4].mxu1  ;;  %608 = vst [vmem:[#allocation10] sm:$0xff] %v592_v3  ;;  %616 = vst [vmem:[#allocation10 + $0x40] sm:$0xff] %v600_v4  ;;  %v499_v14 = vmax.f32 %v483_v1, 1e-12 }
 0x16a   :  { %v507_v16 = vmax.f32 %v491_v2, 1e-12  ;;  %v469_v23 = vmul.f32 2.0, %v748_v10  ;;  %v477_v24 = vmul.f32 2.0, %v760_v12  ;;  %v482_v25 = vsub.f32 %v1152_v11, %v466_v6  ;;  %v286_v29 = vpop.f32.mrb[5].mxu0  ;;  %v326_v30 = vpop.f32.mrb[5].mxu1 }
 0x16b   :  { %v490_v28 = vsub.f32 %v1205_v32, %v474_v8  ;;  %v595_v35 = vsel %vm579_vm6, 0.0, %v499_v14  ;;  %v468_v39 = vmul.f32 2.0, %v286_v29  ;;  %v476_v40 = vmul.f32 2.0, %v326_v30 }
 0x16c   :  { %v603_v36 = vsel %vm587_vm7, 0.0, %v507_v16  ;;  %v485_v37 = vsub.f32 %v1169_v19, %v469_v23  ;;  %v493_v11 = vsub.f32 %v1208_v33, %v477_v24  ;;  %611 = vst [vmem:[#allocation10 + $0x18] sm:$0xff] %v595_v35  ;;  %v498_v32 = vmax.f32 %v482_v25, 1e-12  ;;  %v751_v17 = vpop.f32.mrb[6].mxu0  ;;  %v763_v18 = vpop.f32.mrb[6].mxu1 }
 0x16d   :  { %619 = vst [vmem:[#allocation10 + $0x58] sm:$0xff] %v603_v36  ;;  %v506_v38 = vmax.f32 %v490_v28, 1e-12  ;;  %v484_v46 = vsub.f32 %v1172_v20, %v468_v39  ;;  %v492_v48 = vsub.f32 %v1217_v43, %v476_v40  ;;  %v296_v7 = vpop.f32.mrb[7].mxu0  ;;  %v336_v49 = vpop.f32.mrb[7].mxu1  ;;  %v471_v51 = vmul.f32 2.0, %v751_v17 }
 0x16e   :  { %v501_v44 = vmax.f32 %v485_v37, 1e-12  ;;  %v509_v45 = vmax.f32 %v493_v11, 1e-12  ;;  %v594_v19 = vsel %vm578_vm8, 0.0, %v498_v32  ;;  %v479_v54 = vmul.f32 2.0, %v763_v18 }
 0x16f   :  { %v602_v33 = vsel %vm586_vm9, 0.0, %v506_v38  ;;  %610 = vst [vmem:[#allocation10 + $0x10] sm:$0xff] %v594_v19  ;;  %v500_v27 = vmax.f32 %v484_v46, 1e-12  ;;  %v508_v20 = vmax.f32 %v492_v48, 1e-12  ;;  %v487_v56 = vsub.f32 %v1175_v21, %v471_v51 }
 0x170   :  { %618 = vst [vmem:[#allocation10 + $0x50] sm:$0xff] %v602_v33  ;;  %v597_v50 = vsel %vm581_vm10, 0.0, %v501_v44  ;;  %v605_v26 = vsel %vm589_vm11, 0.0, %v509_v45  ;;  %v470_v55 = vmul.f32 2.0, %v296_v7  ;;  %v478_v43 = vmul.f32 2.0, %v336_v49 }
 0x171   :  { %613 = vst [vmem:[#allocation10 + $0x28] sm:$0xff] %v597_v50  ;;  %621 = vst [vmem:[#allocation10 + $0x68] sm:$0xff] %v605_v26  ;;  %v495_v31 = vsub.f32 %v1235_v58, %v479_v54  ;;  %v596_v41 = vsel %vm580_vm12, 0.0, %v500_v27  ;;  %v604_v57 = vsel %vm588_vm13, 0.0, %v508_v20  ;;  %v503_v21 = vmax.f32 %v487_v56, 1e-12 }
 0x172   :  { %v486_v59 = vsub.f32 %v1178_v22, %v470_v55  ;;  %v494_v60 = vsub.f32 %v462_v5, %v478_v43  ;;  %612 = vst [vmem:[#allocation10 + $0x20] sm:$0xff] %v596_v41  ;;  %620 = vst [vmem:[#allocation10 + $0x60] sm:$0xff] %v604_v57 }
 0x173   :  { %v511_v58 = vmax.f32 %v495_v31, 1e-12  ;;  %v599_v47 = vsel %vm583_vm14, 0.0, %v503_v21 }
 0x174   :  { %v502_v61 = vmax.f32 %v486_v59, 1e-12  ;;  %v510_v42 = vmax.f32 %v494_v60, 1e-12  ;;  %615 = vst [vmem:[#allocation10 + $0x38] sm:$0xff] %v599_v47 }
 0x175   :  { %v607_v22 = vsel %vm591_vm15, 0.0, %v511_v58 }
 0x176   :  { %623 = vst [vmem:[#allocation10 + $0x78] sm:$0xff] %v607_v22  ;;  %v598_v62 = vsel %vm582_vm0, 0.0, %v502_v61  ;;  %v606_v63 = vsel %vm590_vm1, 0.0, %v510_v42 }
 0x177   :  { %614 = vst [vmem:[#allocation10 + $0x30] sm:$0xff] %v598_v62  ;;  %622 = vst [vmem:[#allocation10 + $0x70] sm:$0xff] %v606_v63 }
 0x178   :  { %937 = shalt.err (!%p934_p8)
}
 0x179   :  { %s938_s16 = scalar_lea.hbm %s1323_s4, 2048 }
 0x17a   :  { %p939_p9 = scmp.ne.s32.totalorder %s1323_s4, %s938_s16  ;;  %p942_p10 = scmp.lt.u32.totalorder %s938_s16, %s1323_s4 }
 0x17c   :  { %p944_p11 = pnand %p942_p10, %p939_p9 }
 0x17e   :  { %947 = shalt.err (!%p944_p11)
}
 0x17f   :  { %635 = dma.vmem_to_hbm [thread:$0]  %s630_s1, 2048, %s1323_s4, [#allocation4], %s958_s27, %s958_s27, %s959_s28  }
 0x180   :  { %954 = dma.done.wait [#allocation4], 2048  }
 0x181   :  { %955 = vsyncadd [#allocation4], 4294965248 }
 0x182   :  { %639 = vsyncpa [#allocation3], 1 }
 0x183   :  { %640 = vsyncpa [#allocation6], 1 }
 0x184   :  { %641 = vsyncpa [#allocation9], 1 }
 0x185   :  { %642 = vsyncpa [#allocation4], 1 }

</bundles_post_ra>
